<compile_context>
chip_gen: v7x
topology: tpu7x:2x2x1
jax: 0.10.0
libtpu: 0.0.40
codegen_flags: <defaults>
</compile_context>

<pallas_src>
import jax
import jax.numpy as jnp
from jax.experimental import pallas as pl
from jax.experimental.pallas import tpu as pltpu


def _round_up(x, m):
    return (x + m - 1) // m * m


def _mlp_g_kernel(x_ref,
                  w1_ref, b1_ref,
                  w2_ref, b2_ref,
                  w3_ref, b3_ref,
                  w4_ref, b4_ref,
                  o_ref):
    """One (batch-tile, N-tile) grid step of the fused 4-layer MLP.

    Three Linear+ReLU stages on the small pinned weights (recomputed per
    N-tile; O(ngf^2), negligible), then one N-tile of the final Linear.
    bf16 MXU inputs, f32 accumulation / bias add / ReLU.
    """
    x = x_ref[...]                                                  # (TB, nz) bf16

    h = jnp.dot(x, w1_ref[...], preferred_element_type=jnp.float32) + b1_ref[...]
    h = jnp.maximum(h, 0.0).astype(jnp.bfloat16)

    h = jnp.dot(h, w2_ref[...], preferred_element_type=jnp.float32) + b2_ref[...]
    h = jnp.maximum(h, 0.0).astype(jnp.bfloat16)

    h = jnp.dot(h, w3_ref[...], preferred_element_type=jnp.float32) + b3_ref[...]
    h = jnp.maximum(h, 0.0).astype(jnp.bfloat16)

    out = jnp.dot(h, w4_ref[...], preferred_element_type=jnp.float32) + b4_ref[...]
    o_ref[...] = out.astype(o_ref.dtype)                            # (TB, TN)


def _tpu_vmem_capacity():
    try:
        return int(pltpu.get_tpu_info().vmem_capacity_bytes)
    except Exception:
        return 64 * 1024 * 1024          # conservative fallback (v7x per-TC size)


def _pick_tiles(B, nz, ngf, out_dim, out_itemsize):
    """Choose (tb, tn, grid_b, grid_n, vmem_limit) from the chip's VMEM."""
    vmem_cap = _tpu_vmem_capacity()
    # Scoped budget with headroom: ~48 MiB on v7x (64 MiB physical),
    # 96 MiB on v5e/v6e (128 MiB physical).
    budget = min(vmem_cap * 3 // 4, 96 * 1024 * 1024)

    # ---- batch tile: full batch as one block when small, else 256/512 rows ----
    tb_cap = 512 if vmem_cap >= 96 * 1024 * 1024 else 256
    tb = B if B <= tb_cap else tb_cap            # tb==B is a legal full-dim block
    grid_b = pl.cdiv(B, tb)

    # ---- final-layer N tile: lane-dense, VMEM-budgeted, no w4/b4 padding ----
    n128 = _round_up(out_dim, 128)
    if out_dim <= 128:
        tn = out_dim
    else:
        pinned = 2 * ((nz * ngf + 2 * ngf * ngf) * 2 + 3 * ngf * 4)   # w1-3 bf16, b1-3 f32
        z_bytes = 2 * tb * max(nz, 128) * 2
        slack = 4 * 1024 * 1024                                       # compiler scratch
        per_col = 2 * (tb * out_itemsize + ngf * 2 + 4)               # out + w4 + b4, x2 buffers
        cap = (budget - pinned - z_bytes - slack) // per_col
        cap = min(cap, 8192, n128)
        if grid_b == 1 and n128 >= 256:
            # Keep >= 2 grid steps so a 2-TC chip (v7x) can shard the grid.
            cap = min(cap, 128 * (-(-(n128 // 128) // 2)))
        cap = max(128 * (cap // 128), 128)
        if cap >= n128:
            tn = out_dim          # whole final layer per batch tile: w4 pinned resident
        else:
            # Prefer a tn that exactly divides n128 (no masked-boundary work);
            # fall back to the largest multiple of 128 under the cap.
            units = n128 // 128
            best = 128
            for k in range(cap // 128, 0, -1):
                if units % k == 0:
                    best = 128 * k
                    break
            tn = best if best * 2 >= cap else cap
    grid_n = pl.cdiv(out_dim, tn)
    return tb, tn, grid_b, grid_n, budget


def mlp_g_forward(z, params, *, nc, isize, out_dtype=jnp.float32):
    """Fused MLP_G forward. z: (B, nz) -> (B, nc, isize, isize) in `out_dtype`.

    Pass out_dtype=jnp.bfloat16 to halve the dominant output-store HBM traffic
    (GAN generator outputs rarely need f32); default f32 matches the module.
    """
    B, nz = z.shape
    (w1, b1), (w2, b2), (w3, b3), (w4, b4) = params
    ngf = int(w1.shape[1])
    out_dim = nc * isize * isize
    assert int(w4.shape[1]) == out_dim

    out_itemsize = jnp.dtype(out_dtype).itemsize
    tb, tn, grid_b, grid_n, vmem_limit = _pick_tiles(B, nz, ngf, out_dim, out_itemsize)
    grid = (grid_b, grid_n)

    z_bf16 = z.astype(jnp.bfloat16)

    pinned = lambda shape: pl.BlockSpec(shape, lambda i, j: (0, 0))

    # Advisory cost estimate (layers 1-3 recomputed per N-tile).
    flops = 2 * grid_b * tb * grid_n * (nz * ngf + 2 * ngf * ngf + ngf * tn)
    w4_streams = 1 if grid_n == 1 else grid_b
    bytes_accessed = (
        B * nz * 2
        + (nz * ngf + 2 * ngf * ngf) * 2 + 3 * ngf * 4
        + (ngf * out_dim * 2 + out_dim * 4) * w4_streams
        + B * out_dim * out_itemsize
    )

    out_flat = pl.pallas_call(
        _mlp_g_kernel,
        out_shape=jax.ShapeDtypeStruct((B, out_dim), out_dtype),
        grid=grid,
        in_specs=[
            pl.BlockSpec((tb, nz), lambda i, j: (i, 0)),     # z batch tile
            pinned(w1.shape), pinned(b1.shape),              # small layers: VMEM-resident
            pinned(w2.shape), pinned(b2.shape),
            pinned(w3.shape), pinned(b3.shape),
            pl.BlockSpec((ngf, tn), lambda i, j: (0, j)),    # w4 N-tile (pinned if grid_n==1)
            pl.BlockSpec((1, tn), lambda i, j: (0, j)),      # b4 N-tile
        ],
        out_specs=pl.BlockSpec((tb, tn), lambda i, j: (i, j)),
        compiler_params=pltpu.CompilerParams(
            dimension_semantics=("parallel", "parallel"),
            vmem_limit_bytes=vmem_limit,
        ),
        cost_estimate=pl.CostEstimate(
            flops=flops, transcendentals=0, bytes_accessed=bytes_accessed),
    )(z_bf16, w1, b1, w2, b2, w3, b3, w4, b4)

    # Output is exactly (B, out_dim): torch-style .view is a free reshape,
    # no pad-then-slice copy of the largest tensor.
    return out_flat.reshape(B, nc, isize, isize)


def init_mlp_g_params(key, nz, ngf, nc, isize):
    """nn.Linear-style U(-1/sqrt(fan_in), 1/sqrt(fan_in)) init.

    Weights stored pre-transposed as (in_features, out_features) in bf16 (MXU
    native); biases kept f32 as (1, out_features) for the f32 bias add.
    """
    dims = [(nz, ngf), (ngf, ngf), (ngf, ngf), (ngf, nc * isize * isize)]
    params = []
    for (fan_in, fan_out) in dims:
        key, kw, kb = jax.random.split(key, 3)
        bound = 1.0 / jnp.sqrt(jnp.float32(fan_in))
        w = jax.random.uniform(kw, (fan_in, fan_out), jnp.float32, -bound, bound)
        b = jax.random.uniform(kb, (1, fan_out), jnp.float32, -bound, bound)
        params.append((w.astype(jnp.bfloat16), b))
    return params


def mlp_g_reference(z, params, *, nc, isize):
    """Pure-JAX reference with the same mixed precision as the kernel."""
    h = z.astype(jnp.bfloat16)
    for i, (w, b) in enumerate(params):
        h = jnp.dot(h, w, preferred_element_type=jnp.float32) + b
        if i < len(params) - 1:
            h = jnp.maximum(h, 0.0).astype(jnp.bfloat16)
    return h.reshape(z.shape[0], nc, isize, isize)


if __name__ == "__main__":
    # Small, module-consistent shapes: batch=2, nz=8, ngf=32, nc=3, isize=16.
    # out_dim = 3*16*16 = 768 -> grid (1, 2): exercises the N-tiled path.
    B, nz, ngf, nc, isize = 2, 8, 32, 3, 16

    key = jax.random.PRNGKey(0)
    key, kz = jax.random.split(key)
    z = jax.random.normal(kz, (B, nz), dtype=jnp.float32)

    params = init_mlp_g_params(key, nz, ngf, nc, isize)

    out = mlp_g_forward(z, params, nc=nc, isize=isize)
    out = jax.block_until_ready(out)

    ref = mlp_g_reference(z, params, nc=nc, isize=isize)
    assert out.shape == (B, nc, isize, isize), out.shape
    max_err = float(jnp.max(jnp.abs(out - ref)))
    assert jnp.allclose(out, ref, atol=2e-2, rtol=2e-2), f"mismatch vs reference: {max_err}"

    print("KERNEL_OK")
</pallas_src>

<mosaic_0001>
module attributes {stable_mosaic.version = 11 : i64} {
  func.func @_mlp_g_kernel(%arg0: i32, %arg1: i32, %arg2: memref<2x8xbf16, #tpu.memory_space<vmem>>, %arg3: memref<8x32xbf16, #tpu.memory_space<vmem>>, %arg4: memref<1x32xf32, #tpu.memory_space<vmem>>, %arg5: memref<32x32xbf16, #tpu.memory_space<vmem>>, %arg6: memref<1x32xf32, #tpu.memory_space<vmem>>, %arg7: memref<32x32xbf16, #tpu.memory_space<vmem>>, %arg8: memref<1x32xf32, #tpu.memory_space<vmem>>, %arg9: memref<32x384xbf16, #tpu.memory_space<vmem>>, %arg10: memref<1x384xf32, #tpu.memory_space<vmem>>, %arg11: memref<2x384xf32, #tpu.memory_space<vmem>>) attributes {dimension_semantics = [#tpu.dimension_semantics<parallel>, #tpu.dimension_semantics<parallel>], iteration_bounds = array<i64: 1, 2>, scalar_prefetch = 0 : i64, scratch_operands = 0 : i64, tpu.core_type = #tpu.core_type<tc>, window_params = [{transform_indices = @transform_0, window_bounds = array<i64: 2, 8>}, {pipeline_mode = #tpu.pipeline_mode<synchronous>, transform_indices = @transform_1, window_bounds = array<i64: 8, 32>}, {pipeline_mode = #tpu.pipeline_mode<synchronous>, transform_indices = @transform_2, window_bounds = array<i64: 1, 32>}, {pipeline_mode = #tpu.pipeline_mode<synchronous>, transform_indices = @transform_3, window_bounds = array<i64: 32, 32>}, {pipeline_mode = #tpu.pipeline_mode<synchronous>, transform_indices = @transform_4, window_bounds = array<i64: 1, 32>}, {pipeline_mode = #tpu.pipeline_mode<synchronous>, transform_indices = @transform_5, window_bounds = array<i64: 32, 32>}, {pipeline_mode = #tpu.pipeline_mode<synchronous>, transform_indices = @transform_6, window_bounds = array<i64: 1, 32>}, {transform_indices = @transform_7, window_bounds = array<i64: 32, 384>}, {transform_indices = @transform_8, window_bounds = array<i64: 1, 384>}, {transform_indices = @transform_9, window_bounds = array<i64: 2, 384>}]} {
    %c0 = arith.constant 0 : index
    %c0_0 = arith.constant 0 : index
    %0 = vector.load %arg2[%c0, %c0_0] : memref<2x8xbf16, #tpu.memory_space<vmem>>, vector<2x8xbf16>
    %c0_1 = arith.constant 0 : index
    %c0_2 = arith.constant 0 : index
    %1 = vector.load %arg3[%c0_1, %c0_2] : memref<8x32xbf16, #tpu.memory_space<vmem>>, vector<8x32xbf16>
    %cst = arith.constant dense<0.000000e+00> : vector<2x32xf32>
    %2 = tpu.matmul %0, %1, %cst {dimension_numbers = #tpu.dot_dimension_numbers<[1], [0], [0], [1], [0, 0, 1, 1], [], []>} : vector<2x8xbf16>, vector<8x32xbf16>, vector<2x32xf32> -> vector<2x32xf32>
    %c0_3 = arith.constant 0 : index
    %c0_4 = arith.constant 0 : index
    %3 = vector.load %arg4[%c0_3, %c0_4] : memref<1x32xf32, #tpu.memory_space<vmem>>, vector<1x32xf32>
    %4 = vector.broadcast %3 : vector<1x32xf32> to vector<2x32xf32>
    %5 = arith.addf %2, %4 : vector<2x32xf32>
    %cst_5 = arith.constant 0.000000e+00 : f32
    %6 = vector.broadcast %cst_5 : f32 to vector<2x32xf32>
    %7 = arith.maximumf %5, %6 : vector<2x32xf32>
    %8 = arith.truncf %7 : vector<2x32xf32> to vector<2x32xbf16>
    %c0_6 = arith.constant 0 : index
    %c0_7 = arith.constant 0 : index
    %9 = vector.load %arg5[%c0_6, %c0_7] : memref<32x32xbf16, #tpu.memory_space<vmem>>, vector<32x32xbf16>
    %cst_8 = arith.constant dense<0.000000e+00> : vector<2x32xf32>
    %10 = tpu.matmul %8, %9, %cst_8 {dimension_numbers = #tpu.dot_dimension_numbers<[1], [0], [0], [1], [0, 0, 1, 1], [], []>} : vector<2x32xbf16>, vector<32x32xbf16>, vector<2x32xf32> -> vector<2x32xf32>
    %c0_9 = arith.constant 0 : index
    %c0_10 = arith.constant 0 : index
    %11 = vector.load %arg6[%c0_9, %c0_10] : memref<1x32xf32, #tpu.memory_space<vmem>>, vector<1x32xf32>
    %12 = vector.broadcast %11 : vector<1x32xf32> to vector<2x32xf32>
    %13 = arith.addf %10, %12 : vector<2x32xf32>
    %cst_11 = arith.constant 0.000000e+00 : f32
    %14 = vector.broadcast %cst_11 : f32 to vector<2x32xf32>
    %15 = arith.maximumf %13, %14 : vector<2x32xf32>
    %16 = arith.truncf %15 : vector<2x32xf32> to vector<2x32xbf16>
    %c0_12 = arith.constant 0 : index
    %c0_13 = arith.constant 0 : index
    %17 = vector.load %arg7[%c0_12, %c0_13] : memref<32x32xbf16, #tpu.memory_space<vmem>>, vector<32x32xbf16>
    %cst_14 = arith.constant dense<0.000000e+00> : vector<2x32xf32>
    %18 = tpu.matmul %16, %17, %cst_14 {dimension_numbers = #tpu.dot_dimension_numbers<[1], [0], [0], [1], [0, 0, 1, 1], [], []>} : vector<2x32xbf16>, vector<32x32xbf16>, vector<2x32xf32> -> vector<2x32xf32>
    %c0_15 = arith.constant 0 : index
    %c0_16 = arith.constant 0 : index
    %19 = vector.load %arg8[%c0_15, %c0_16] : memref<1x32xf32, #tpu.memory_space<vmem>>, vector<1x32xf32>
    %20 = vector.broadcast %19 : vector<1x32xf32> to vector<2x32xf32>
    %21 = arith.addf %18, %20 : vector<2x32xf32>
    %cst_17 = arith.constant 0.000000e+00 : f32
    %22 = vector.broadcast %cst_17 : f32 to vector<2x32xf32>
    %23 = arith.maximumf %21, %22 : vector<2x32xf32>
    %24 = arith.truncf %23 : vector<2x32xf32> to vector<2x32xbf16>
    %c0_18 = arith.constant 0 : index
    %c0_19 = arith.constant 0 : index
    %25 = vector.load %arg9[%c0_18, %c0_19] : memref<32x384xbf16, #tpu.memory_space<vmem>>, vector<32x384xbf16>
    %cst_20 = arith.constant dense<0.000000e+00> : vector<2x384xf32>
    %26 = tpu.matmul %24, %25, %cst_20 {dimension_numbers = #tpu.dot_dimension_numbers<[1], [0], [0], [1], [0, 0, 1, 1], [], []>} : vector<2x32xbf16>, vector<32x384xbf16>, vector<2x384xf32> -> vector<2x384xf32>
    %c0_21 = arith.constant 0 : index
    %c0_22 = arith.constant 0 : index
    %27 = vector.load %arg10[%c0_21, %c0_22] : memref<1x384xf32, #tpu.memory_space<vmem>>, vector<1x384xf32>
    %28 = vector.broadcast %27 : vector<1x384xf32> to vector<2x384xf32>
    %29 = arith.addf %26, %28 : vector<2x384xf32>
    %c0_23 = arith.constant 0 : index
    %c0_24 = arith.constant 0 : index
    %30 = vector.load %arg11[%c0_23, %c0_24] : memref<2x384xf32, #tpu.memory_space<vmem>>, vector<2x384xf32>
    tpu.vector_store %arg11[%c0_23, %c0_24], %29 {strides = array<i32>} : memref<2x384xf32, #tpu.memory_space<vmem>>, vector<2x384xf32>,
    return
  }
  func.func @transform_0(%arg0: i32, %arg1: i32) -> (i32, i32) {
    %c0_i32 = arith.constant 0 : i32
    %c0_i32_0 = arith.constant 0 : i32
    return %arg0, %c0_i32 : i32, i32
  }
  func.func @transform_1(%arg0: i32, %arg1: i32) -> (i32, i32) {
    %c0_i32 = arith.constant 0 : i32
    %c0_i32_0 = arith.constant 0 : i32
    %c0_i32_1 = arith.constant 0 : i32
    return %c0_i32, %c0_i32_0 : i32, i32
  }
  func.func @transform_2(%arg0: i32, %arg1: i32) -> (i32, i32) {
    %c0_i32 = arith.constant 0 : i32
    %c0_i32_0 = arith.constant 0 : i32
    %c0_i32_1 = arith.constant 0 : i32
    return %c0_i32, %c0_i32_0 : i32, i32
  }
  func.func @transform_3(%arg0: i32, %arg1: i32) -> (i32, i32) {
    %c0_i32 = arith.constant 0 : i32
    %c0_i32_0 = arith.constant 0 : i32
    %c0_i32_1 = arith.constant 0 : i32
    return %c0_i32, %c0_i32_0 : i32, i32
  }
  func.func @transform_4(%arg0: i32, %arg1: i32) -> (i32, i32) {
    %c0_i32 = arith.constant 0 : i32
    %c0_i32_0 = arith.constant 0 : i32
    %c0_i32_1 = arith.constant 0 : i32
    return %c0_i32, %c0_i32_0 : i32, i32
  }
  func.func @transform_5(%arg0: i32, %arg1: i32) -> (i32, i32) {
    %c0_i32 = arith.constant 0 : i32
    %c0_i32_0 = arith.constant 0 : i32
    %c0_i32_1 = arith.constant 0 : i32
    return %c0_i32, %c0_i32_0 : i32, i32
  }
  func.func @transform_6(%arg0: i32, %arg1: i32) -> (i32, i32) {
    %c0_i32 = arith.constant 0 : i32
    %c0_i32_0 = arith.constant 0 : i32
    %c0_i32_1 = arith.constant 0 : i32
    return %c0_i32, %c0_i32_0 : i32, i32
  }
  func.func @transform_7(%arg0: i32, %arg1: i32) -> (i32, i32) {
    %c0_i32 = arith.constant 0 : i32
    %c0_i32_0 = arith.constant 0 : i32
    return %c0_i32, %arg1 : i32, i32
  }
  func.func @transform_8(%arg0: i32, %arg1: i32) -> (i32, i32) {
    %c0_i32 = arith.constant 0 : i32
    %c0_i32_0 = arith.constant 0 : i32
    return %c0_i32, %arg1 : i32, i32
  }
  func.func @transform_9(%arg0: i32, %arg1: i32) -> (i32, i32) {
    %c0_i32 = arith.constant 0 : i32
    return %arg0, %arg1 : i32, i32
  }
}

</mosaic_0001>

<bundles_post_ra>
// kernel: tpu_custom_call.1
= control target key start
LH: loop header
LB: loop body
LE: loop exit
PB: predicated region body
PF: predicated region fallthrough
CT: control target
= control target key end

     0   :  { %s1950_s0 = inlined_call_operand.hbm [shape: bf16[2,8], index: 0, kind: input, shape index: {}]   ;;  %s1951_s1 = inlined_call_operand.hbm [shape: bf16[8,32], index: 1, kind: input, shape index: {}]   ;;  %s1952_s2 = inlined_call_operand.hbm [shape: f32[1,32], index: 2, kind: input, shape index: {}]   ;;  %s1953_s3 = inlined_call_operand.hbm [shape: bf16[32,32], index: 3, kind: input, shape index: {}]   ;;  %s1954_s4 = inlined_call_operand.hbm [shape: f32[1,32], index: 4, kind: input, shape index: {}]   ;;  %s1955_s5 = inlined_call_operand.vmem [shape: bf16[32,32], index: 5, kind: input, shape index: {}]   ;;  %s1956_s6 = inlined_call_operand.hbm [shape: f32[1,32], index: 6, kind: input, shape index: {}]   ;;  %s1957_s7 = inlined_call_operand.hbm [shape: bf16[32,768], index: 7, kind: input, shape index: {}]   ;;  %s1958_s8 = inlined_call_operand.vmem [shape: f32[1,768], index: 8, kind: input, shape index: {}]   ;;  %s1959_s9 = inlined_call_operand.hbm [shape: f32[2,768], index: 9, kind: output, shape index: {}]  }
   0x1   :  { %1965 = sst [smem:[#allocation22_spill]] %s1950_s0 }
   0x2   :  { %1966 = sst [smem:[#allocation23_spill]] %s1951_s1 }
   0x3   :  { %1967 = sst [smem:[#allocation24_spill]] %s1958_s8 }
   0x4   :  { %1968 = sst [smem:[#allocation25_spill]] %s1959_s9 }
   0x5   :  { %14 = vsyncpa [#allocation3], 0 }
   0x6   :  { %15 = vsyncpa [#allocation6], 0 }
   0x7   :  { %16 = vsyncpa [#allocation9], 0 }
   0x8   :  { %17 = vsyncpa [#allocation12], 0 }
   0x9   :  { %18 = vsyncpa [#allocation4], 0 }
   0xa   :  { %20 = vsyncpa [#allocation4 + $0x1], 0  ;;  %s1587_s30 = smov 0   ;;  %s1589_s10 = smov 0  }
   0xb   :  { %s1591_s11 = smov 0   ;;  %s1593_s12 = smov 0  }
   0xc   :  { %s1595_s13 = smov 0   ;;  %s1597_s14 = smov 0  }
   0xd LB: > { %1969 = sst [smem:[#allocation21_spill]] %s1510_s12  ;;  %s1618_s15 = sadd.s32 4294967295, %s1518_s14   ;;  %s1518_s14 = sphi %s1597_s14, %s26_s14   ;;  %s1514_s13 = sphi %s1595_s13, %s2000_s13   ;;  %s1510_s12 = sphi %s1593_s12, %s1999_s12   ;;  %s1506_s11 = sphi %s1591_s11, %s1998_s11   ;;  %s1502_s10 = sphi %s1589_s10, %s1997_s10   ;;  %s1498_s30 = sphi %s1587_s30, %s1996_s30  }
   0xe   : > { %p995_p0 = scmp.ge.s32.totalorder %s1518_s14, 1  ;;  %p1960_p1 = scmp.eq.s32.totalorder %s1618_s15, 0 }
   0xf   : > { %p275_p2 = scmp.lt.s32.totalorder %s1518_s14, 3  ;;  %s1520_s17 = smov [#allocation2]  }
  0x10   : > { %s290_s18 = sshll.u32 %s1520_s17, 4  ;;  %s1521_s19 = smov [#allocation5]   ;;  %s291_s18 = int_to_ptr.vmem [resolvable:$true] %s290_s18 }
  0x11   : > { %p1623_p3 = pnand %p995_p0, %p275_p2  ;;  %s301_s20 = sshll.u32 %s1521_s19, 4  ;;  %s1636_s20 = int_to_ptr.vmem [resolvable:$true] %s301_s20 }
  0x12   : > { %s1522_s22 = smov [#allocation8]   ;;  %s1972_s0 = sld [smem:[#allocation22_spill]] }
  0x13   : > { %s1970_s16 = scalar_select %p1623_p3, 1, 0 }
  0x14   : > { %p1106_p5 = pneg %p1623_p3  ;;  %s322_s23 = sshll.u32 %s1522_s22, 4  ;;  %s1638_s23 = int_to_ptr.vmem [resolvable:$true] %s322_s23 }
  0x16   : > { %p1632_p6 = pnand %p1106_p5, %p1960_p1 }
  0x18   : > { %s1222_s26 = scalar_lea.hbm %s1972_s0, 16  ;;  %p1648_p8 = pneg %p1632_p6 }
  0x19   : > { %p1223_p7 = scmp.ne.s32.totalorder %s1972_s0, %s1222_s26  ;;  %p1229_p11 = scmp.lt.u32.totalorder %s1222_s26, %s1972_s0 }
  0x1b   : > { %p1225_p9 = pnand %p1648_p8, %p1223_p7 }
  0x1d   : > { %p1226_p10 = pneg %p1225_p9 }
  0x1f   : > { %p1231_p12 = pnand %p1229_p11, %p1226_p10 }
  0x21   : > { %1234 = shalt.err (!%p1231_p12)
}
  0x22   : > { %s1235_s22 = scalar_lea.vmem %s291_s18, 16  ;;  %s1242_s24 = scalar_lea.vmem %s291_s18, 32 }
  0x23   : > { %p1236_p13 = scmp.ne.s32.totalorder %s291_s18, %s1235_s22  ;;  %p1243_p5 = scmp.lt.s32.totalorder %s291_s18, %s291_s18 }
  0x24   : > { %p1244_p4 = scmp.lt.s32.totalorder %s1242_s24, %s1235_s22 }
  0x25   : > { %p1238_p0 = pnand %p1236_p13, %p1648_p8 }
  0x26   : > { %p1245_p1 = por %p1244_p4, %p1243_p5 }
  0x27   : > { %p1239_p2 = pneg %p1238_p0 }
  0x29   : > { %p1246_p3 = pnand %p1245_p1, %p1239_p2 }
  0x2b   : > { %1249 = shalt.err (!%p1246_p3)
}
  0x2c   : > { %1109 = dma.hbm_to_vmem [thread:$0]  (!%p1632_p6), %s1972_s0, 16, %s291_s18, [#allocation3]  }
  0x2d   : > { %s1974_s1 = sld [smem:[#allocation23_spill]] }
  0x33   : > { %s1250_s17 = scalar_lea.hbm %s1974_s1, 64 }
  0x34   : > { %p1251_p7 = scmp.ne.s32.totalorder %s1974_s1, %s1250_s17  ;;  %p1257_p1 = scmp.lt.u32.totalorder %s1250_s17, %s1974_s1 }
  0x36   : > { %p1253_p9 = pnand %p1251_p7, %p1648_p8 }
  0x38   : > { %p1254_p4 = pneg %p1253_p9 }
  0x3a   : > { %p1259_p3 = pnand %p1257_p1, %p1254_p4 }
  0x3c   : > { %1262 = shalt.err (!%p1259_p3)
}
  0x3d   : > { %s1263_s18 = scalar_lea.vmem %s1636_s20, 64  ;;  %p1271_p13 = scmp.lt.s32.totalorder %s1636_s20, %s1636_s20 }
  0x3e   : > { %p1264_p10 = scmp.ne.s32.totalorder %s1636_s20, %s1263_s18  ;;  %p1272_p0 = scmp.lt.s32.totalorder %s1263_s18, %s1263_s18 }
  0x40   : > { %p1266_p11 = pnand %p1264_p10, %p1648_p8  ;;  %p1273_p2 = por %p1272_p0, %p1271_p13 }
  0x42   : > { %p1267_p12 = pneg %p1266_p11 }
  0x44   : > { %p1274_p5 = pnand %p1273_p2, %p1267_p12 }
  0x46   : > { %1277 = shalt.err (!%p1274_p5)
}
  0x47   : > { %1112 = dma.hbm_to_vmem [thread:$0]  (!%p1632_p6), %s1974_s1, 64, %s1636_s20, [#allocation6]  }
  0x48   : > { %s1278_s28 = scalar_lea.hbm %s1953_s3, 256 }
  0x49   : > { %p1279_p7 = scmp.ne.s32.totalorder %s1953_s3, %s1278_s28  ;;  %p1285_p1 = scmp.lt.u32.totalorder %s1278_s28, %s1953_s3 }
  0x4b   : > { %p1281_p9 = pnand %p1279_p7, %p1648_p8 }
  0x4d   : > { %p1282_p4 = pneg %p1281_p9 }
  0x4f   : > { %p1287_p3 = pnand %p1285_p1, %p1282_p4 }
  0x51   : > { %1290 = shalt.err (!%p1287_p3)
}
  0x52   : > { %s1291_s20 = scalar_lea.vmem %s1638_s23, 256  ;;  %p1299_p13 = scmp.lt.s32.totalorder %s1638_s23, %s1638_s23 }
  0x53   : > { %p1292_p10 = scmp.ne.s32.totalorder %s1638_s23, %s1291_s20  ;;  %p1300_p0 = scmp.lt.s32.totalorder %s1291_s20, %s1291_s20 }
  0x55   : > { %p1294_p11 = pnand %p1292_p10, %p1648_p8  ;;  %p1301_p2 = por %p1300_p0, %p1299_p13 }
  0x57   : > { %p1295_p12 = pneg %p1294_p11 }
  0x59   : > { %p1302_p5 = pnand %p1301_p2, %p1295_p12 }
  0x5b   : > { %1305 = shalt.err (!%p1302_p5)
}
  0x5c   : > { %s1523_s18 = smov 64   ;;  %s1524_s9 = smov 4  }
  0x5d   : > { %1118 = dma.hbm_to_vmem [thread:$0]  (!%p1632_p6), %s1953_s3, 256, %s1638_s23, [#allocation9], %s1523_s18, %s1523_s18, %s1524_s9  }
  0x5e   : > { %s1525_s26 = smov [#allocation7]   ;;  %s1526_s17 = smov [#allocation10]  }
  0x5f   : > { %s312_s28 = sshll.u32 %s1525_s26, 4  ;;  %s336_s19 = sshll.u32 %s1526_s17, 4  ;;  %s313_s28 = int_to_ptr.vmem [resolvable:$true] %s312_s28  ;;  %s337_s19 = int_to_ptr.vmem [resolvable:$true] %s336_s19 }
  0x60   : > { %s1306_s20 = scalar_lea.hbm %s1952_s2, 16 }
  0x61   : > { %p1307_p7 = scmp.ne.s32.totalorder %s1952_s2, %s1306_s20  ;;  %p1313_p1 = scmp.lt.u32.totalorder %s1306_s20, %s1952_s2 }
  0x63   : > { %p1309_p9 = pnand %p1307_p7, %p1648_p8 }
  0x65   : > { %p1310_p4 = pneg %p1309_p9 }
  0x67   : > { %p1315_p3 = pnand %p1313_p1, %p1310_p4 }
  0x69   : > { %1318 = shalt.err (!%p1315_p3)
}
  0x6a   : > { %s1319_s23 = scalar_lea.vmem %s313_s28, 16  ;;  %s1326_s18 = scalar_lea.vmem %s313_s28, 32 }
  0x6b   : > { %p1320_p10 = scmp.ne.s32.totalorder %s313_s28, %s1319_s23  ;;  %p1327_p13 = scmp.lt.s32.totalorder %s313_s28, %s313_s28 }
  0x6c   : > { %p1328_p0 = scmp.lt.s32.totalorder %s1326_s18, %s1319_s23 }
  0x6d   : > { %p1322_p11 = pnand %p1320_p10, %p1648_p8 }
  0x6e   : > { %p1329_p2 = por %p1328_p0, %p1327_p13 }
  0x6f   : > { %p1323_p12 = pneg %p1322_p11 }
  0x71   : > { %p1330_p5 = pnand %p1329_p2, %p1323_p12 }
  0x73   : > { %1333 = shalt.err (!%p1330_p5)
}
  0x74   : > { %1115 = dma.hbm_to_vmem [thread:$0]  (!%p1632_p6), %s1952_s2, 16, %s313_s28, [#allocation6]  }
  0x75   : > { %s1334_s9 = scalar_lea.hbm %s1954_s4, 16 }
  0x76   : > { %p1335_p7 = scmp.ne.s32.totalorder %s1954_s4, %s1334_s9  ;;  %p1341_p1 = scmp.lt.u32.totalorder %s1334_s9, %s1954_s4 }
  0x78   : > { %p1337_p9 = pnand %p1335_p7, %p1648_p8 }
  0x7a   : > { %p1338_p4 = pneg %p1337_p9 }
  0x7c   : > { %p1343_p3 = pnand %p1341_p1, %p1338_p4 }
  0x7e   : > { %1346 = shalt.err (!%p1343_p3)
}
  0x7f   : > { %s1347_s22 = scalar_lea.vmem %s337_s19, 16  ;;  %s1354_s28 = scalar_lea.vmem %s337_s19, 32 }
  0x80   : > { %p1348_p10 = scmp.ne.s32.totalorder %s337_s19, %s1347_s22  ;;  %p1355_p13 = scmp.lt.s32.totalorder %s337_s19, %s337_s19 }
  0x81   : > { %p1356_p0 = scmp.lt.s32.totalorder %s1354_s28, %s1347_s22 }
  0x82   : > { %p1350_p11 = pnand %p1348_p10, %p1648_p8 }
  0x83   : > { %p1357_p2 = por %p1356_p0, %p1355_p13 }
  0x84   : > { %p1351_p12 = pneg %p1350_p11 }
  0x86   : > { %p1358_p5 = pnand %p1357_p2, %p1351_p12 }
  0x88   : > { %1361 = shalt.err (!%p1358_p5)
}
  0x89   : > { %1121 = dma.hbm_to_vmem [thread:$0]  (!%p1632_p6), %s1954_s4, 16, %s337_s19, [#allocation9]  }
  0x8a   : > { %s1527_s23 = smov [#allocation11]   ;;  %s1362_s8 = scalar_lea.hbm %s1956_s6, 16 }
  0x8b   : > { %s350_s18 = sshll.u32 %s1527_s23, 4  ;;  %p1363_p7 = scmp.ne.s32.totalorder %s1956_s6, %s1362_s8  ;;  %s351_s18 = int_to_ptr.vmem [resolvable:$true] %s350_s18 }
  0x8c   : > { %p1369_p1 = scmp.lt.u32.totalorder %s1362_s8, %s1956_s6 }
  0x8d   : > { %p1365_p9 = pnand %p1363_p7, %p1648_p8 }
  0x8f   : > { %p1366_p4 = pneg %p1365_p9 }
  0x91   : > { %p1371_p3 = pnand %p1369_p1, %p1366_p4 }
  0x93   : > { %1374 = shalt.err (!%p1371_p3)
}
  0x94   : > { %s1375_s19 = scalar_lea.vmem %s351_s18, 16  ;;  %s1382_s26 = scalar_lea.vmem %s351_s18, 32 }
  0x95   : > { %p1376_p10 = scmp.ne.s32.totalorder %s351_s18, %s1375_s19  ;;  %p1383_p13 = scmp.lt.s32.totalorder %s351_s18, %s351_s18 }
  0x96   : > { %p1384_p0 = scmp.lt.s32.totalorder %s1382_s26, %s1375_s19 }
  0x97   : > { %p1378_p11 = pnand %p1376_p10, %p1648_p8 }
  0x98   : > { %p1385_p2 = por %p1384_p0, %p1383_p13 }
  0x99   : > { %p1379_p12 = pneg %p1378_p11 }
  0x9b   : > { %p1386_p5 = pnand %p1385_p2, %p1379_p12 }
  0x9d   : > { %1389 = shalt.err (!%p1386_p5)
}
  0x9e   : > { %1124 = dma.hbm_to_vmem [thread:$0]  (!%p1632_p6), %s1956_s6, 16, %s351_s18, [#allocation12]  }
  0x9f   : > { %s994_s29 = sadd.s32 4294967294, %s1518_s14   ;;  %s35_s28 = sadd.s32 1, %s1514_s13 }
  0xa0   : > { %p36_p8 = scmp.ge.s32.totalorder %s35_s28, 2  ;;  %s197_s21 = sadd.s32 1, %s1506_s11 }
  0xa1   : > { %p204_p7 = scmp.ne.s32.totalorder %s1506_s11, %s1502_s10  ;;  %p205_p9 = scmp.eq.s32.totalorder %s1518_s14, 0 }
  0xa2   : > { %s2002_s28 = smov (%p36_p8, %s35_s28), 0  ;;  %p210_p6 = scmp.ne.s32.totalorder %s1502_s10, %s1498_s30 }
  0xa3   : > { %p1772_p4 = por %p205_p9, %p204_p7  ;;  %s194_s20 = ssub.s32 %s1514_s13, %s2002_s28 }
  0xa4   : > { %p262_p1 = scmp.eq.s32.totalorder %s1618_s15, 1  ;;  %p195_p3 = scmp.eq.s32.totalorder %s194_s20, 0 }
  0xa5   : > { %p1976_p10 = scmp.eq.s32.totalorder %s1618_s15, 0  ;;  %p268_p13 = scmp.eq.s32.totalorder %s994_s29, 1 }
  0xa6   : > { %p1787_p12 = por %p262_p1, %p204_p7  ;;  %p1139_p2 = scmp.lt.s32.totalorder %s1518_s14, 2 }
  0xa7   : > { %p1783_p11 = por %p1976_p10, %p210_p6  ;;  %p1794_p0 = por %p268_p13, %p210_p6 }
  0xa8   : > { %s1978_s18 = scalar_select %p1787_p12, 1, 0 }
  0xa9   : > { %s1792_s0 = scalar_select %p195_p3, %s1506_s11, %s197_s21  }
  0xaa   : > { %s1979_s1 = scalar_select %p1794_p0, 1, 0 }
  0xab   : > { %s361_s8 = sand.u32 1, %s1518_s14   ;;  %s363_s12 = sand.u32 1, %s1506_s11  }
  0xac   : > { %s1075_s9 = smul.u32 48, %s363_s12  ;;  %p1804_p5 = pnand %p1139_p2, %p1772_p4 }
  0xad   : > { %s1032_s25 = smul.u32 192, %s1514_s13  ;;  %s1815_s21 = scalar_lea.sflag [#allocation3], %s361_s8 }
  0xae   : > { %s365_s22 = scalar_lea.vmem [#allocation13], %s1075_s9  ;;  %p1392_p7 = pneg %p1804_p5 }
  0xaf   : > { %s1811_s17 = scalar_lea.hbm %s1957_s7, %s1032_s25  ;;  %s372_s29 = sshll.u32 %s365_s22, 4  ;;  %s1813_s29 = int_to_ptr.vmem [resolvable:$true] %s372_s29 }
  0xb0   : > { %s1390_s24 = scalar_lea.hbm %s1811_s17, 768  ;;  %s1395_s25 = scalar_lea.hbm %s1957_s7, 1536 }
  0xb1   : > { %p1391_p8 = scmp.ne.s32.totalorder %s1811_s17, %s1390_s24  ;;  %p1396_p6 = scmp.lt.u32.totalorder %s1811_s17, %s1957_s7 }
  0xb2   : > { %p1397_p1 = scmp.lt.u32.totalorder %s1395_s25, %s1390_s24  ;;  %p1399_p10 = scmp.lt.u32.totalorder %s1390_s24, %s1811_s17 }
  0xb3   : > { %p1393_p9 = pnand %p1392_p7, %p1391_p8 }
  0xb4   : > { %p1398_p3 = por %p1397_p1, %p1396_p6 }
  0xb5   : > { %p1394_p4 = pneg %p1393_p9 }
  0xb6   : > { %p1400_p13 = por %p1399_p10, %p1398_p3 }
  0xb8   : > { %p1401_p2 = pnand %p1400_p13, %p1394_p4 }
  0xba   : > { %1404 = shalt.err (!%p1401_p2)
}
  0xbb   : > { %s1405_s8 = scalar_lea.vmem %s1813_s29, 768  ;;  %s1528_s9 = smov [#allocation13]  }
  0xbc   : > { %p1406_p8 = scmp.ne.s32.totalorder %s1813_s29, %s1405_s8  ;;  %s1410_s22 = sshll.u32 %s1528_s9, 4  ;;  %s1411_s22 = int_to_ptr.vmem [resolvable:$false] %s1410_s22 }
  0xbd   : > { %s1412_s20 = scalar_lea.vmem %s1411_s22, 1536  ;;  %p1413_p12 = scmp.lt.s32.totalorder %s1813_s29, %s1411_s22 }
  0xbe   : > { %p1408_p9 = pnand %p1406_p8, %p1392_p7  ;;  %p1414_p6 = scmp.lt.s32.totalorder %s1412_s20, %s1405_s8 }
  0xc0   : > { %p1409_p0 = pneg %p1408_p9  ;;  %p1415_p1 = por %p1414_p6, %p1413_p12 }
  0xc2   : > { %p1416_p3 = pnand %p1415_p1, %p1409_p0 }
  0xc4   : > { %1419 = shalt.err (!%p1416_p3)
}
  0xc5   : > { %s1529_s24 = smov 384   ;;  %s1530_s12 = smov 192  }
  0xc6   : > { %s1531_s25 = smov 12   ;;  %p1981_p7 = scmp.ne.s32.totalorder %s1970_s16, 0 }
  0xc7   : > { %1128 = dma.hbm_to_vmem [thread:$0]  (!%p1804_p5), %s1811_s17, 768, %s1813_s29, %s1815_s21, %s1529_s24, %s1530_s12, %s1531_s25  }
  0xc8   : > { %392 = sbr.rel (%p1981_p7) target bundleno = 1118 (0x45e), region = 56  ;;  %p1982_p4 = scmp.eq.s32.totalorder (!%p1981_p7), %s1618_s15, 0 }
  0xcf   : > { %1473 = dma.done.wait (%p1982_p4), [#allocation3], 16   ;;  %p1983_p10 = pmov %p1982_p4 }
  0xd0   : > { %p1984_p12 = pmov %p1982_p4 }
  0xd1   : > { %1475 = vsyncadd (%p1983_p10), [#allocation3], 4294967280 }
  0xd2   : > { %1477 = dma.done.wait (%p1984_p12), [#allocation6], 80   ;;  %p1985_p0 = pmov %p1982_p4 }
  0xd4   : > { %1479 = vsyncadd (%p1985_p0), [#allocation6], 4294967216  ;;  %p1986_p13 = pmov %p1985_p0 }
  0xd5   : > { %p1987_p5 = pmov %p1985_p0 }
  0xd6   : > { %1481 = dma.done.wait (%p1986_p13), [#allocation9], 272  }
  0xd7   : > { %1483 = vsyncadd (%p1987_p5), [#allocation9], 4294967024  ;;  %p1988_p2 = pmov %p1985_p0 }
  0xd8   : > { %p1989_p8 = pmov %p1985_p0 }
  0xd9   : > { %1485 = dma.done.wait (%p1988_p2), [#allocation12], 16  }
  0xda   : > { %1487 = vsyncadd (%p1989_p8), [#allocation12], 4294967280  ;;  %s418_s16 = sand.u32 1, %s1618_s15   ;;  %s1863_s27 = sand.u32 1, %s1502_s10  }
  0xdb   : > { %s1076_s17 = smul.u32 48, %s1863_s27  ;;  %s419_s29 = scalar_lea.sflag [#allocation3], %s418_s16 }
  0xdd   : > { %s1866_s21 = scalar_lea.vmem [#allocation13], %s1076_s17 }
  0xde   : > { %1489 = dma.done.wait (%p1783_p11), %s419_s29, 768  }
  0xdf   : > { %1491 = vsyncadd (%p1783_p11), %s419_s29, 4294966528  ;;  %v1532_v0 = vmov 0.0   ;;  %vm1533_vm0 = vmmov 0   ;;  %vm482_vm1 = vcmask 1043456   ;;  %v470_v1 = vld [vmem:[#allocation5] sm:$0xf]  ;;  %v675_v39 = vlaneseq }
  0xe0   : > { %1045 = vmatprep.subr.bf16.mxu0 %v1532_v0  ;;  %1047 = vmatprep.mubr.msk.bf16.mxu0 %vm1533_vm0, %v1532_v0  ;;  %v469_v2 = vld [vmem:[#allocation2] sm:$0x1]  ;;  %vm478_vm2 = vcmask 64512   ;;  %v484_v3 = vsel %vm482_vm1, %v470_v1, 0  ;;  %v1210_v4 = vld [vmem:[#allocation8] sm:$0xff]   ;;  %v1211_v5 = vld [vmem:[#allocation8 + $0x8] sm:$0xff]  }
  0xe1   : > { %1051 = vmatprep.subr.bf16.mxu1 %v1532_v0  ;;  %1055 = vmatprep.mubr.msk.bf16.mxu1 %vm1533_vm0, %v1532_v0  ;;  %v1212_v6 = vld [vmem:[%s1955_s5] sm:$0xff]   ;;  %v1011_v7 = vld [vmem:[#allocation7] ss:$0 sm:$0xff]  ;;  %vm551_vm3 = vcmask 261120   ;;  %v1213_v15 = vld [vmem:[%s1955_s5 + $0x8] sm:$0xff]   ;;  %s1990_s8 = sld [smem:[#allocation21_spill]] }
  0xe2   : > { %1046 = vmatpush3.bf16.msra.mxu0 %v484_v3  ;;  %1052 = vmatpush3.bf16.msra.mxu1 %v1210_v4  ;;  %v1214_v16 = vld [vmem:[%s1866_s21] ss:$12 sps:$4 sm:$0xff]   ;;  %v1216_v17 = vld [vmem:[%s1866_s21 + $0x4] ss:$12 sps:$4 sm:$0xff]   ;;  %v1217_v26 = vld [vmem:[%s1866_s21 + $0x8] ss:$12 sps:$4 sm:$0xff]  }
  0xe3   : > { %1059 = vmatprep.subr.bf16.mxu0 %v1532_v0  ;;  %1053 = vmatprep.subr.bf16.mxu1 %v1532_v0  ;;  %v1013_v18 = vld [vmem:[#allocation10] ss:$0 sm:$0xff]  ;;  %v1218_v28 = vld [vmem:[%s1866_s21 + $0x18] ss:$12 sps:$4 sm:$0xff]   ;;  %v1534_v30 = vmov 0   ;;  %v676_v40 = vshrl.u32 %v675_v39, 7 }
  0xe4   : > { %v1220_v27 = vld [vmem:[%s1866_s21 + $0x1c] ss:$12 sps:$4 sm:$0xff]   ;;  %v1221_v29 = vld [vmem:[%s1866_s21 + $0x20] ss:$12 sps:$4 sm:$0xff]   ;;  %s1991_s24 = sld [smem:[#allocation24_spill]]  ;;  %s1077_s25 = smul.u32 6, %s1863_s27 }
  0xe5   : > { %1048 = vmatmul.mubr.msk.bf16.vlgmr.msra.gmra.mrb[0].mxu0 %vm478_vm2, %v469_v2  ;;  %v1017_v31 = vld [vmem:[#allocation11] ss:$0 sm:$0xff]  ;;  %v677_v41 = vsub.s32 0, %v676_v40  ;;  %v685_v43 = vsub.s32 2, %v676_v40  ;;  %v1535_v44 = vmov 1983009808  }
  0xe6   : > { %1063 = vmatprep.mubr.msk.bf16.mxu0 %vm1533_vm0, %v1532_v0  ;;  %1054 = vmatpush3.bf16.msra.mxu1 %v1211_v5  ;;  %v811_v45 = vunpack.c.l.s4 %v1535_v44  ;;  %v681_v46 = vsub.s32 1, %v676_v40  ;;  %s460_s17 = scalar_lea.vmem [#allocation14], %s1077_s25  ;;  %s1992_s23 = sld [smem:[#allocation25_spill]] }
  0xe7   : > { %1060 = vmatpush3.bf16.msra.mxu0 %v1212_v6  ;;  %725 = vmatprep.subr.bf16.mxu1 %v1216_v17  ;;  %s462_s9 = smul.u32 3, %s1990_s8  ;;  %s844_s29 = sshll.u32 %s460_s17, 4  ;;  %s1903_s29 = int_to_ptr.vmem [resolvable:$true] %s844_s29 }
  0xe8   : > { %1061 = vmatprep.subr.bf16.mxu0 %v1532_v0  ;;  %v812_v49 = vunpack.c.0.s8 %v811_v45  ;;  %s1033_s16 = smul.u32 96, %s1990_s8  ;;  %s828_s26 = scalar_lea.sflag [#allocation4], %s1863_s27 }
  0xe9   : > { %p463_p11 = scmp.lt.s32.totalorder %s462_s9, 5  ;;  %p1993_p6 = scmp.ne.s32.totalorder %s1978_s18, 0 }
  0xea   : > { %v815_v57 = vsub.s32 %v812_v49, %v676_v40  ;;  %s1536_s8 = smov [#allocation14]  }
  0xeb   : > { %1062 = vmatpush3.bf16.msra.mxu0 %v1213_v15  ;;  %s2004_s9 = smov (!%p463_p11, %s462_s9), 5  ;;  %s1424_s22 = sshll.u32 %s1536_s8, 4  ;;  %s1425_s22 = int_to_ptr.vmem [resolvable:$false] %s1424_s22 }
  0xec   : > { %1067 = vmatprep.subr.bf16.mxu0 %v1532_v0  ;;  %s465_s12 = scalar_lea.vmem %s1991_s24, %s2004_s9  ;;  %s1901_s19 = scalar_lea.hbm %s1992_s23, %s1033_s16 }
  0xed   : > { %v673_v42 = vld [vmem:[%s465_s12] sm:$0x7]  ;;  %s1420_s9 = scalar_lea.vmem %s1903_s29, 96  ;;  %s1426_s20 = scalar_lea.vmem %s1425_s22, 192 }
  0xee   : > { %v678_v47 = vrot.slane %v673_v42, %v677_v41  ;;  %v686_v48 = vrot.slane %v673_v42, %v685_v43  ;;  %v682_v50 = vrot.slane %v673_v42, %v681_v46  ;;  %p1421_p9 = scmp.ne.s32.totalorder %s1903_s29, %s1420_s9  ;;  %p1427_p7 = scmp.lt.s32.totalorder %s1903_s29, %s1425_s22 }
  0xef   : > { %p1428_p4 = scmp.lt.s32.totalorder %s1426_s20, %s1420_s9 }
  0xf0   : > { %p1422_p1 = pnand %p1421_p9, %p1993_p6 }
  0xf1   : > { %p1429_p10 = por %p1428_p4, %p1427_p7 }
  0xf2   : > { %p1423_p3 = pneg %p1422_p1 }
  0xf4   : > { %p1430_p12 = pnand %p1429_p10, %p1423_p3 }
 0x1b8   : > { %v520_v8 = vpop.f32.mrb[0].mxu0 }
 0x1b9   : > { %v521_v9 = vadd.f32 %v1011_v7, %v520_v8  ;;  %v1049_v10 = vpop.f32.mrb[1].mxu0 }
 0x1ba   : > { %v523_v11 = vpop.f32.mrb[2].mxu0 }
 0x1bb   : > { %v526_v12 = vmax.f32 %v521_v9, 0.0  ;;  %v1050_v13 = vpop.f32.mrb[3].mxu0 }
 0x1bd   : > { %v527_v14 = vpack.c.bf16 %v526_v12, %v526_v12 }
 0x1bf   : > { %1056 = vmatmul.mubr.msk.bf16.vlgmr.msra.gmra.mrb[0].mxu1 %vm551_vm3, %v527_v14 }
 0x1c0   : > { %726 = vmatpush1.bf16.msra.mxu1 %v1214_v16  ;;  %757 = vmatprep.mubr.bf16.mxu1 %v1534_v30 }
 0x1c1   : > { %727 = vmatprep.subr.bf16.mxu1 %v1220_v27 }
 0x1c4   : > { %728 = vmatpush1.bf16.msra.mxu1 %v1218_v28 }
 0x292   : > { %v589_v19 = vpop.f32.mrb[0].mxu1 }
 0x293   : > { %v590_v20 = vadd.f32 %v1013_v18, %v589_v19  ;;  %v1057_v21 = vpop.f32.mrb[1].mxu1 }
 0x294   : > { %v592_v22 = vpop.f32.mrb[2].mxu1 }
 0x295   : > { %v595_v23 = vmax.f32 %v590_v20, 0.0  ;;  %v1058_v24 = vpop.f32.mrb[3].mxu1 }
 0x297   : > { %v596_v25 = vpack.c.bf16 %v595_v23, %v595_v23 }
 0x299   : > { %1064 = vmatmul.mubr.msk.bf16.vlgmr.msra.gmra.mrb[4].mxu0 %vm551_vm3, %v596_v25 }
 0x29a   : > { %1071 = vmatprep.mubr.msk.bf16.mxu0 %vm1533_vm0, %v1532_v0  ;;  %1068 = vmatpush3.bf16.msra.mxu0 %v1217_v26 }
 0x29b   : > { %1069 = vmatprep.subr.bf16.mxu0 %v1532_v0 }
 0x29e   : > { %1070 = vmatpush3.bf16.msra.mxu0 %v1221_v29 }
 0x36c   : > { %v657_v32 = vpop.f32.mrb[4].mxu0 }
 0x36d   : > { %v658_v33 = vadd.f32 %v1017_v31, %v657_v32  ;;  %v1065_v34 = vpop.f32.mrb[5].mxu0 }
 0x36e   : > { %v660_v35 = vpop.f32.mrb[6].mxu0 }
 0x36f   : > { %v663_v36 = vmax.f32 %v658_v33, 0.0  ;;  %v1066_v37 = vpop.f32.mrb[7].mxu0 }
 0x371   : > { %v664_v38 = vpack.c.bf16 %v663_v36, %v663_v36 }
 0x373   : > { %1027 = vmatmul.mubr.msk.bf16.vlgmr.msra.gmra.mrb[4].mxu1 %vm551_vm3, %v664_v38  ;;  %1072 = vmatmul.mubr.msk.bf16.vlgmr.msra.gmra.mrb[8].mxu0 %vm551_vm3, %v664_v38 }
 0x446   : > { %v759_v51 = vpop.f32.mrb[4].mxu1  ;;  %v800_v52 = vpop.f32.mrb[8].mxu0 }
 0x447   : > { %v760_v53 = vadd.f32 %v759_v51, %v678_v47  ;;  %v761_v54 = vpop.f32.mrb[5].mxu1  ;;  %v1073_v55 = vpop.f32.mrb[9].mxu0  ;;  %v801_v56 = vadd.f32 %v800_v52, %v686_v48 }
 0x448   : > { %v762_v58 = vadd.f32 %v761_v54, %v682_v50  ;;  %v763_v59 = vpop.f32.mrb[6].mxu1  ;;  %v803_v60 = vpop.f32.mrb[10].mxu0 }
 0x449   : > { %v764_v61 = vpop.f32.mrb[7].mxu1  ;;  %v1074_v62 = vpop.f32.mrb[11].mxu0  ;;  %v823_v0 = vrot.slane %v801_v56, %v815_v57 }
 0x44a   : > { %v809_v63 = vcombine.low %v760_v53, %v762_v58 }
 0x44c   : > { %v816_v1 = vrot.slane %v809_v63, %v815_v57 }
 0x44e   : > { %v824_v2 = vcombine.low %v816_v1, %v823_v0 }
 0x450   : > { %826 = vst [vmem:[%s460_s17] sm:$0x3f] %v824_v2 }
 0x451   : > { %1433 = shalt.err (!%p1430_p12)
}
 0x452   : > { %s1434_s27 = scalar_lea.hbm %s1901_s19, 96  ;;  %s1438_s25 = scalar_lea.hbm %s1992_s23, 192 }
 0x453   : > { %p1435_p0 = scmp.ne.s32.totalorder %s1901_s19, %s1434_s27  ;;  %p1439_p2 = scmp.lt.u32.totalorder %s1901_s19, %s1992_s23 }
 0x454   : > { %p1440_p8 = scmp.lt.u32.totalorder %s1438_s25, %s1434_s27  ;;  %p1442_p9 = scmp.lt.u32.totalorder %s1434_s27, %s1901_s19 }
 0x455   : > { %p1436_p13 = pnand %p1435_p0, %p1993_p6 }
 0x456   : > { %p1441_p11 = por %p1440_p8, %p1439_p2 }
 0x457   : > { %p1437_p5 = pneg %p1436_p13 }
 0x458   : > { %p1443_p1 = por %p1442_p9, %p1441_p11 }
 0x45a   : > { %p1444_p3 = pnand %p1443_p1, %p1437_p5 }
 0x45c   : > { %1447 = shalt.err (!%p1444_p3)
}
 0x45d   : > { %1104 = dma.vmem_to_hbm [thread:$0]  (%p1993_p6), %s1903_s29, 96, %s1901_s19, %s828_s26  }
 0x45e PF: > { %s856_s21 = sand.u32 1, %s1498_s30   ;;  %p1994_p7 = scmp.ne.s32.totalorder %s1979_s1, 0 }
 0x45f   : > { %p1995_p4 = scmp.ge.s32.totalorder %s1518_s14, 2  ;;  %s857_s15 = scalar_lea.sflag [#allocation4], %s856_s21 }
 0x461   : > { %p1130_p10 = pnand %p1995_p4, %p1994_p7 }
 0x463   : > { %1493 = dma.done.wait (!%p1130_p10), %s857_s15, 96  }
 0x464   : > { %1495 = vsyncadd (!%p1130_p10), %s857_s15, 4294967200  ;;  %s26_s14 = sadd.s32 1, %s1518_s14   ;;  %s1996_s30 = smov %s1502_s10 }
 0x465   : > { %p23_p12 = scmp.ge.s32.totalorder %s26_s14, 4   ;;  %s1997_s10 = smov %s1506_s11 }
 0x466   : > { %s1998_s11 = smov %s1792_s0  ;;  %s1999_s12 = smov %s1514_s13 }
 0x467   : > { %s2000_s13 = smov %s2002_s28  ;;  %25 = sbr.rel (!%p23_p12) target bundleno = 13 (0xd), region = 128 }
 0x46e   :  { %862 = vsyncpa [#allocation3], 1 }
 0x46f   :  { %864 = vsyncpa [#allocation3 + $0x1], 1 }
 0x470   :  { %865 = vsyncpa [#allocation6], 1 }
 0x471   :  { %866 = vsyncpa [#allocation9], 1 }
 0x472   :  { %867 = vsyncpa [#allocation12], 1 }
 0x473   :  { %868 = vsyncpa [#allocation4], 1 }
 0x474   :  { %870 = vsyncpa [#allocation4 + $0x1], 1 }

</bundles_post_ra>
